<compile_context>
chip_gen: v7x
topology: tpu7x:2x2x1
jax: 0.10.0
libtpu: 0.0.40
codegen_flags: <defaults>
</compile_context>

<pallas_src>
import math

import jax
import jax.numpy as jnp
from jax import lax
from jax.experimental import pallas as pl
from jax.experimental.pallas import tpu as pltpu


def _hist_softmax_kernel(tok_ref, c_ref, w_ref, out_ref):
    """One grid step = one batch block (bb lanes).

    tok_ref : (T_pad, bb) int32  BOS-prepended token ids; padded seq rows = -1
    c_ref   : (H, 1)      f32    logit of the constant BOS query against a key
                                 of token id j (already scaled by 1/sqrt(D))
    w_ref   : (H, H)      f32    Wo @ diag(mask) @ Wv with BOS residual folded
    out_ref : (H, bb)     f32    output logits, batch on the 128-lane axis
    """
    t_pad, bb = tok_ref.shape
    hidden = w_ref.shape[0]
    tc = 8                                   # one sublane group of token rows
    n_chunks = t_pad // tc

    # iota over the hidden axis, hoisted (JAX does not CSE broadcast_in_dim).
    iota_h = lax.broadcasted_iota(jnp.int32, (tc, hidden, bb), 1)

    def chunk_body(i, count):
        start = pl.multiple_of(i * tc, tc)
        chunk = tok_ref[pl.ds(start, tc), :]                         # (tc, bb)
        onehot = (chunk[:, None, :] == iota_h).astype(jnp.float32)   # (tc, H, bb)
        # reduce over the leading (sequence) axis: plain VPU vreg adds
        return count + jnp.sum(onehot, axis=0)

    count = lax.fori_loop(0, n_chunks, chunk_body,
                          jnp.zeros((hidden, bb), jnp.float32), unroll=True)

    # Exact softmax over the keys, expressed per token id, weighted by counts.
    # m = max over *present* token ids so every exp argument is <= 0.
    c = c_ref[...]                                                   # (H, 1)
    present = count > 0.0                                            # (H, bb)
    m = jnp.max(jnp.where(present, c, -1e30), axis=0, keepdims=True) # (1, bb)
    e = jnp.exp(jnp.where(present, c - m, 0.0))                      # (H, bb)
    p_un = count * e
    denom = jnp.sum(p_un, axis=0, keepdims=True)                     # (1, bb)
    # Exact division (not approx reciprocal): the residual fold in w_ref relies
    # on sum_j p[:, b] == 1.
    p = p_un / denom                                                 # (H, bb)

    # One MXU matmul: (H, H) @ (H, bb) -> lane-dense (H, bb) store.
    out_ref[...] = jnp.dot(w_ref[...], p, preferred_element_type=jnp.float32)


def single_head_transformer_forward(tokens, wq, wk, wv, wo, head_dim_mask=None,
                                    *, vocab_size, head_dim):
    """tokens: (B, S) int32. Returns (B, vocab_size + 1) float32."""
    hidden = vocab_size + 1
    d = head_dim
    batch, seq = tokens.shape
    t = seq + 1                                      # BOS prepended

    if head_dim_mask is None:
        head_dim_mask = jnp.ones((d,), dtype=jnp.int32)

    # ---- exact algebraic folds (one-time, tiny XLA work) ----
    # position-0 query = BOS one-hot row:   q0 = Wq[:, 2]
    # logit of a key with token id j:       c[j] = (q0 @ Wk)[j] / sqrt(D)
    q0 = wq[:, 2]
    c_col = ((q0 @ wk) / math.sqrt(d)).astype(jnp.float32).reshape(hidden, 1)
    # fused attention-output weight with mask and BOS residual folded in:
    #   out = (Wo @ diag(mask) @ Wv) @ p + e2 * (sum_j p)  =  W_fold @ p
    w_fused = (wo.astype(jnp.float32)
               @ (head_dim_mask.astype(jnp.float32)[:, None] * wv.astype(jnp.float32)))
    e2 = (jnp.arange(hidden) == 2).astype(jnp.float32)
    w_fold = (w_fused + e2[:, None]).astype(jnp.float32)             # (H, H)

    # ---- token layout: sequence on sublanes, batch on lanes ----
    toks = jnp.concatenate(
        [jnp.full((batch, 1), 2, dtype=jnp.int32), tokens.astype(jnp.int32)], axis=1)

    lane = 128
    if batch <= lane:
        bb = lane
    else:
        # >= 2 "parallel" blocks keep both v7x TensorCores busy; lane-multiple
        # width, capped at 512 to amortize per-grid-step overhead.
        half_up = -(-batch // 2)
        bb = min(512, -(-half_up // lane) * lane)
    n_blocks = -(-batch // bb)
    b_pad = n_blocks * bb
    t_pad = -(-t // 8) * 8

    toks_tb = toks.T                                                  # (T, B)
    toks_tb = jnp.pad(toks_tb, ((0, t_pad - t), (0, 0)), constant_values=-1)
    toks_tb = jnp.pad(toks_tb, ((0, 0), (0, b_pad - batch)), constant_values=0)

    out_t = pl.pallas_call(
        _hist_softmax_kernel,
        out_shape=jax.ShapeDtypeStruct((hidden, b_pad), jnp.float32),
        grid_spec=pltpu.PrefetchScalarGridSpec(
            num_scalar_prefetch=0,
            grid=(n_blocks,),
            in_specs=[
                pl.BlockSpec((t_pad, bb), lambda i: (0, i)),          # token ids
                pl.BlockSpec((hidden, 1), lambda i: (0, 0)),          # per-token-id logits
                pl.BlockSpec((hidden, hidden), lambda i: (0, 0)),     # fused weight
            ],
            out_specs=pl.BlockSpec((hidden, bb), lambda i: (0, i)),
        ),
        compiler_params=pltpu.CompilerParams(
            dimension_semantics=("parallel",),
            # Working set per step is ~(T_pad*bb + H + H^2 + H*bb)*4 B, double
            # buffered (tens of KiB here); 32 MiB is an explicit cap that fits
            # every generation including v7x's 64 MiB physical VMEM.
            vmem_limit_bytes=32 * 1024 * 1024,
        ),
    )(toks_tb, c_col, w_fold)

    # lane-dense (H, B_pad) -> (B, H): wrapper-side layout plumbing only.
    return out_t.T[:batch]


def reference_forward(tokens, wq, wk, wv, wo, head_dim_mask, *, vocab_size, head_dim):
    """Pure-JAX reference mirroring the PyTorch forward, for correctness check."""
    hidden = vocab_size + 1
    b, _ = tokens.shape
    bos = jnp.full((b, 1), 2, dtype=tokens.dtype)
    toks = jnp.concatenate([bos, tokens], axis=1)
    y = jax.nn.one_hot(toks, hidden, dtype=jnp.float32)
    q = y @ wq.T
    k = y @ wk.T
    v = y @ wv.T
    a = jax.nn.softmax(q @ jnp.swapaxes(k, -1, -2) / math.sqrt(head_dim), axis=-1)
    h = a @ v
    attn = (head_dim_mask.astype(jnp.float32) * h) @ wo.T
    out = attn + y
    return out[:, 0, :]                  # unembedding weight = identity


if __name__ == "__main__":
    vocab_size = 7                       # hidden_dim = 8
    head_dim = 4
    batch = 2
    seq = 8
    hidden_dim = vocab_size + 1

    key = jax.random.PRNGKey(0)
    k_tok, k_q, k_k, k_v, k_o = jax.random.split(key, 5)

    tokens = jax.random.randint(k_tok, (batch, seq), 0, vocab_size, dtype=jnp.int32)

    # nn.Linear-style weight shapes: (out_features, in_features).
    wq = jax.random.normal(k_q, (head_dim, hidden_dim), dtype=jnp.float32) * 0.1
    wk = jax.random.normal(k_k, (head_dim, hidden_dim), dtype=jnp.float32) * 0.1
    wv = jax.random.normal(k_v, (head_dim, hidden_dim), dtype=jnp.float32) * 0.1
    wo = jax.random.normal(k_o, (hidden_dim, head_dim), dtype=jnp.float32) * 0.1
    head_dim_mask = jnp.ones((head_dim,), dtype=jnp.int32)   # module default

    out = single_head_transformer_forward(
        tokens, wq, wk, wv, wo, head_dim_mask, vocab_size=vocab_size, head_dim=head_dim
    )
    out = jax.block_until_ready(out)

    ref = reference_forward(
        tokens, wq, wk, wv, wo, head_dim_mask, vocab_size=vocab_size, head_dim=head_dim
    )
    assert out.shape == (batch, hidden_dim), out.shape
    # Exact softmax division + exact algebraic folds -> f32-rounding-level parity.
    assert jnp.allclose(out, ref, atol=1e-4, rtol=1e-4), (out, ref)

    print("KERNEL_OK")
</pallas_src>

<mosaic_0001>
module attributes {stable_mosaic.version = 11 : i64} {
  func.func @_hist_softmax_kernel(%arg0: i32, %arg1: memref<16x128xi32, #tpu.memory_space<vmem>>, %arg2: memref<8x1xf32, #tpu.memory_space<vmem>>, %arg3: memref<8x8xf32, #tpu.memory_space<vmem>>, %arg4: memref<8x128xf32, #tpu.memory_space<vmem>>) attributes {dimension_semantics = [#tpu.dimension_semantics<parallel>], iteration_bounds = array<i64: 1>, scalar_prefetch = 0 : i64, scratch_operands = 0 : i64, tpu.core_type = #tpu.core_type<tc>, window_params = [{transform_indices = @transform_0, window_bounds = array<i64: 16, 128>}, {pipeline_mode = #tpu.pipeline_mode<synchronous>, transform_indices = @transform_1, window_bounds = array<i64: 8, 1>}, {pipeline_mode = #tpu.pipeline_mode<synchronous>, transform_indices = @transform_2, window_bounds = array<i64: 8, 8>}, {transform_indices = @transform_3, window_bounds = array<i64: 8, 128>}]} {
    %0 = tpu.iota {dimensions = array<i32: 1>} : vector<8x8x128xi32>
    %cst = arith.constant 0.000000e+00 : f32
    %1 = vector.broadcast %cst : f32 to vector<8x128xf32>
    %c0_i32 = arith.constant 0 : i32
    %c8_i32 = arith.constant 8 : i32
    %2 = arith.muli %c0_i32, %c8_i32 : i32
    %3 = tpu.assume_multiple %2, 8 : i32
    %4 = arith.index_cast %3 : i32 to index
    %c0 = arith.constant 0 : index
    %5 = vector.load %arg1[%4, %c0] : memref<16x128xi32, #tpu.memory_space<vmem>>, vector<8x128xi32>
    %6 = vector.shape_cast %5 : vector<8x128xi32> to vector<8x1x128xi32>
    %7 = vector.broadcast %6 : vector<8x1x128xi32> to vector<8x8x128xi32>
    %8 = arith.cmpi eq, %7, %0 : vector<8x8x128xi32>
    %9 = arith.extui %8 : vector<8x8x128xi1> to vector<8x8x128xi32>
    %10 = arith.sitofp %9 : vector<8x8x128xi32> to vector<8x8x128xf32>
    %cst_0 = arith.constant dense<0.000000e+00> : vector<8x128xf32>
    %11 = vector.multi_reduction <add>, %10, %cst_0 [0] : vector<8x8x128xf32> to vector<8x128xf32>
    %12 = arith.addf %1, %11 : vector<8x128xf32>
    %c1_i32 = arith.constant 1 : i32
    %c8_i32_1 = arith.constant 8 : i32
    %13 = arith.muli %c1_i32, %c8_i32_1 : i32
    %14 = tpu.assume_multiple %13, 8 : i32
    %15 = arith.index_cast %14 : i32 to index
    %c0_2 = arith.constant 0 : index
    %16 = vector.load %arg1[%15, %c0_2] : memref<16x128xi32, #tpu.memory_space<vmem>>, vector<8x128xi32>
    %17 = vector.shape_cast %16 : vector<8x128xi32> to vector<8x1x128xi32>
    %18 = vector.broadcast %17 : vector<8x1x128xi32> to vector<8x8x128xi32>
    %19 = arith.cmpi eq, %18, %0 : vector<8x8x128xi32>
    %20 = arith.extui %19 : vector<8x8x128xi1> to vector<8x8x128xi32>
    %21 = arith.sitofp %20 : vector<8x8x128xi32> to vector<8x8x128xf32>
    %cst_3 = arith.constant dense<0.000000e+00> : vector<8x128xf32>
    %22 = vector.multi_reduction <add>, %21, %cst_3 [0] : vector<8x8x128xf32> to vector<8x128xf32>
    %23 = arith.addf %12, %22 : vector<8x128xf32>
    %c2_i32 = arith.constant 2 : i32
    %c0_4 = arith.constant 0 : index
    %c0_5 = arith.constant 0 : index
    %24 = vector.load %arg2[%c0_4, %c0_5] : memref<8x1xf32, #tpu.memory_space<vmem>>, vector<8x1xf32>
    %cst_6 = arith.constant 0.000000e+00 : f32
    %25 = vector.broadcast %cst_6 : f32 to vector<8x128xf32>
    %26 = arith.cmpf ogt, %23, %25 : vector<8x128xf32>
    %cst_7 = arith.constant -1.000000e+30 : f32
    %27 = vector.shape_cast %24 : vector<8x1xf32> to vector<8x1xf32>
    %28 = vector.broadcast %27 : vector<8x1xf32> to vector<8x128xf32>
    %29 = vector.broadcast %cst_7 : f32 to vector<8x128xf32>
    %30 = arith.select %26, %28, %29 : vector<8x128xi1>, vector<8x128xf32>
    %cst_8 = arith.constant dense<0xFF800000> : vector<128xf32>
    %31 = vector.multi_reduction <maximumf>, %30, %cst_8 [0] : vector<8x128xf32> to vector<128xf32>
    %32 = vector.shape_cast %31 : vector<128xf32> to vector<1x128xf32>
    %33 = vector.broadcast %24 : vector<8x1xf32> to vector<8x128xf32>
    %34 = vector.broadcast %32 : vector<1x128xf32> to vector<8x128xf32>
    %35 = arith.subf %33, %34 : vector<8x128xf32>
    %cst_9 = arith.constant 0.000000e+00 : f32
    %36 = vector.broadcast %cst_9 : f32 to vector<8x128xf32>
    %37 = arith.select %26, %35, %36 : vector<8x128xi1>, vector<8x128xf32>
    %38 = math.exp %37 : vector<8x128xf32>
    %39 = arith.mulf %23, %38 : vector<8x128xf32>
    %cst_10 = arith.constant dense<0.000000e+00> : vector<128xf32>
    %40 = vector.multi_reduction <add>, %39, %cst_10 [0] : vector<8x128xf32> to vector<128xf32>
    %41 = vector.shape_cast %40 : vector<128xf32> to vector<1x128xf32>
    %42 = vector.broadcast %41 : vector<1x128xf32> to vector<8x128xf32>
    %43 = arith.divf %39, %42 : vector<8x128xf32>
    %c0_11 = arith.constant 0 : index
    %c0_12 = arith.constant 0 : index
    %44 = vector.load %arg3[%c0_11, %c0_12] : memref<8x8xf32, #tpu.memory_space<vmem>>, vector<8x8xf32>
    %cst_13 = arith.constant dense<0.000000e+00> : vector<8x128xf32>
    %45 = tpu.matmul %44, %43, %cst_13 {dimension_numbers = #tpu.dot_dimension_numbers<[1], [0], [0], [1], [0, 0, 1, 1], [], []>} : vector<8x8xf32>, vector<8x128xf32>, vector<8x128xf32> -> vector<8x128xf32>
    %c0_14 = arith.constant 0 : index
    %c0_15 = arith.constant 0 : index
    %46 = vector.load %arg4[%c0_14, %c0_15] : memref<8x128xf32, #tpu.memory_space<vmem>>, vector<8x128xf32>
    tpu.vector_store %arg4[%c0_14, %c0_15], %45 {strides = array<i32>} : memref<8x128xf32, #tpu.memory_space<vmem>>, vector<8x128xf32>,
    return
  }
  func.func @transform_0(%arg0: i32) -> (i32, i32) {
    %c0_i32 = arith.constant 0 : i32
    %c0_i32_0 = arith.constant 0 : i32
    return %c0_i32, %arg0 : i32, i32
  }
  func.func @transform_1(%arg0: i32) -> (i32, i32) {
    %c0_i32 = arith.constant 0 : i32
    %c0_i32_0 = arith.constant 0 : i32
    %c0_i32_1 = arith.constant 0 : i32
    return %c0_i32, %c0_i32_0 : i32, i32
  }
  func.func @transform_2(%arg0: i32) -> (i32, i32) {
    %c0_i32 = arith.constant 0 : i32
    %c0_i32_0 = arith.constant 0 : i32
    %c0_i32_1 = arith.constant 0 : i32
    return %c0_i32, %c0_i32_0 : i32, i32
  }
  func.func @transform_3(%arg0: i32) -> (i32, i32) {
    %c0_i32 = arith.constant 0 : i32
    %c0_i32_0 = arith.constant 0 : i32
    return %c0_i32, %arg0 : i32, i32
  }
}

</mosaic_0001>

<bundles_post_ra>
// kernel: tpu_custom_call.1
= control target key start
LH: loop header
LB: loop body
LE: loop exit
PB: predicated region body
PF: predicated region fallthrough
CT: control target
= control target key end

     0   :  { %8 = vsyncpa [#allocation3], 0  ;;  %s579_s0 = inlined_call_operand.hbm [shape: s32[16,128], index: 0, kind: input, shape index: {}]   ;;  %s580_s1 = inlined_call_operand.vmem [shape: f32[8,1], index: 1, kind: input, shape index: {}]   ;;  %s581_s2 = inlined_call_operand.vmem [shape: f32[8,8], index: 2, kind: input, shape index: {}]   ;;  %s582_s3 = inlined_call_operand.hbm [shape: f32[8,128], index: 3, kind: output, shape index: {}]  }
   0x1   :  { %9 = vsyncpa [#allocation4], 0  ;;  %s465_s12 = smov [#allocation2]   ;;  %s417_s16 = scalar_lea.hbm %s579_s0, 256 }
   0x2   :  { %s15_s13 = sshll.u32 %s465_s12, 4  ;;  %p418_p0 = scmp.ne.s32.totalorder %s579_s0, %s417_s16  ;;  %s16_s13 = int_to_ptr.vmem [resolvable:$true] %s15_s13 }
   0x3   :  { %p421_p1 = scmp.lt.u32.totalorder %s417_s16, %s579_s0 }
   0x5   :  { %p423_p2 = pnand %p421_p1, %p418_p0 }
   0x7   :  { %426 = shalt.err (!%p423_p2)
}
   0x8   :  { %s427_s21 = scalar_lea.vmem %s16_s13, 256  ;;  %p432_p4 = scmp.lt.s32.totalorder %s16_s13, %s16_s13 }
   0x9   :  { %p428_p3 = scmp.ne.s32.totalorder %s16_s13, %s427_s21  ;;  %p433_p5 = scmp.lt.s32.totalorder %s427_s21, %s427_s21 }
   0xb   :  { %p434_p6 = por %p433_p5, %p432_p4 }
   0xd   :  { %p435_p7 = pnand %p434_p6, %p428_p3 }
   0xf   :  { %438 = shalt.err (!%p435_p7)
}
  0x10   :  { %s466_s22 = smov 128   ;;  %s467_s23 = smov 8  }
  0x11   :  { %21 = dma.hbm_to_vmem [thread:$0]  %s579_s0, 256, %s16_s13, [#allocation3], %s466_s22, %s466_s22, %s467_s23  }
  0x12   :  { %461 = dma.done.wait [#allocation3], 256  }
  0x13   :  { %462 = vsyncadd [#allocation3], 4294967040  ;;  %v468_v0 = vmov 0   ;;  %v469_v1 = vmov 0.0   ;;  %v260_v2 = vld [vmem:[%s580_s1] sm:$0xff]  ;;  %vm470_vm0 = vmmov 0   ;;  %v29_v3 = vlaneseq }
  0x14   :  { %410 = vset.pattern.permute.xlu0 %v468_v0  ;;  %397 = vmatprep.subr.mxu0 %v469_v1  ;;  %v471_v4 = vmov 1966171168   ;;  %v31_v9 = vld [vmem:[#allocation2] sm:$0xff]  ;;  %v146_v10 = vld [vmem:[#allocation2 + $0x8] sm:$0xff]  ;;  %s472_s28 = smov [#allocation5]  }
  0x15   :  { %264 = vperm.xlu0 %410, %v260_v2   ;;  %399 = vmatprep.mubr.msk.f32.mxu0 %vm470_vm0, %v469_v1  ;;  %v34_v5 = vunpack.c.l.s4 %v471_v4  ;;  %v510_v6 = vshrl.u32 %v29_v3, 7  ;;  %v32_v20 = vcombine.high %v31_v9, %v31_v9  ;;  %v147_v21 = vcombine.high %v146_v10, %v146_v10  ;;  %s369_s29 = sshll.u32 %s472_s28, 4  ;;  %s370_s29 = int_to_ptr.vmem [resolvable:$true] %s369_s29 }
  0x16   :  { %s439_s30 = scalar_lea.vmem %s370_s29, 128  ;;  %p444_p9 = scmp.lt.s32.totalorder %s370_s29, %s370_s29 }
  0x17   :  { %v35_v7 = vunpack.c.0.s8 %v34_v5  ;;  %v514_v15 = vsub.s32 0, %v510_v6  ;;  %p440_p8 = scmp.ne.s32.totalorder %s370_s29, %s439_s30  ;;  %p445_p10 = scmp.lt.s32.totalorder %s439_s30, %s439_s30 }
  0x19   :  { %v38_v8 = vsub.s32 %v35_v7, %v510_v6  ;;  %p446_p11 = por %p445_p10, %p444_p9 }
  0x1b   :  { %v39_v11 = vrot.slane %v31_v9, %v38_v8  ;;  %v154_v12 = vrot.slane %v146_v10, %v38_v8  ;;  %v46_v28 = vrot.slane %v32_v20, %v38_v8  ;;  %v161_v29 = vrot.slane %v147_v21, %v38_v8  ;;  %p447_p12 = pnand %p446_p11, %p440_p8 }
  0x1d   :  { %v47_v13 = vcombine.high %v39_v11, %v39_v11  ;;  %v162_v14 = vcombine.high %v154_v12, %v154_v12  ;;  %v55_v16 = vrot.slane %v39_v11, %v38_v8  ;;  %v170_v18 = vrot.slane %v154_v12, %v38_v8 }
  0x1e   :  { %v48_v34 = vcombine.high %v46_v28, %v46_v28  ;;  %v62_v35 = vrot.slane %v46_v28, %v38_v8  ;;  %v163_v36 = vcombine.high %v161_v29, %v161_v29  ;;  %v177_v37 = vrot.slane %v161_v29, %v38_v8 }
  0x1f   :  { %v69_v17 = vrot.slane %v47_v13, %v38_v8  ;;  %v184_v19 = vrot.slane %v162_v14, %v38_v8  ;;  %v77_v22 = vcombine.high %v55_v16, %v55_v16  ;;  %v84_v23 = vrot.slane %v55_v16, %v514_v15 }
  0x20   :  { %v192_v25 = vcombine.high %v170_v18, %v170_v18  ;;  %v199_v26 = vrot.slane %v170_v18, %v514_v15  ;;  %v76_v46 = vrot.slane %v48_v34, %v38_v8  ;;  %v100_v47 = vrot.slane %v62_v35, %v514_v15 }
  0x21   :  { %v88_v24 = vrot.slane %v69_v17, %v514_v15  ;;  %v203_v27 = vrot.slane %v184_v19, %v514_v15  ;;  %v79_v30 = vcombine.high %v69_v17, %v69_v17  ;;  %v92_v31 = vrot.slane %v77_v22, %v514_v15 }
  0x22   :  { %vm113_vm1 = vcmp.eq.s32.totalorder %v84_v23, %v510_v6  ;;  %v194_v32 = vcombine.high %v184_v19, %v184_v19  ;;  %v207_v33 = vrot.slane %v192_v25, %v514_v15  ;;  %vm228_vm3 = vcmp.eq.s32.totalorder %v199_v26, %v510_v6 }
  0x23   :  { %vm114_vm2 = vcmp.eq.s32.totalorder %v88_v24, %v510_v6  ;;  %vm229_vm4 = vcmp.eq.s32.totalorder %v203_v27, %v510_v6  ;;  %v378_v38 = vsel %vm113_vm1, 1.0, %v469_v1  ;;  %v386_v40 = vsel %vm228_vm3, 1.0, %v469_v1 }
  0x24   :  { %v379_v39 = vsel %vm114_vm2, 1.0, %v469_v1  ;;  %v387_v41 = vsel %vm229_vm4, 1.0, %v469_v1  ;;  %v96_v42 = vrot.slane %v79_v30, %v514_v15  ;;  %vm115_vm5 = vcmp.eq.s32.totalorder %v92_v31, %v510_v6 }
  0x25   :  { %v211_v43 = vrot.slane %v194_v32, %v514_v15  ;;  %vm230_vm6 = vcmp.eq.s32.totalorder %v207_v33, %v510_v6  ;;  %v137_v44 = vadd.f32 %v379_v39, %v378_v38  ;;  %v252_v45 = vadd.f32 %v387_v41, %v386_v40 }
  0x26   :  { %v380_v48 = vsel %vm115_vm5, 1.0, %v469_v1  ;;  %v388_v49 = vsel %vm230_vm6, 1.0, %v469_v1  ;;  %vm116_vm7 = vcmp.eq.s32.totalorder %v96_v42, %v510_v6  ;;  %v191_v50 = vrot.slane %v163_v36, %v38_v8  ;;  %v287_v42 = vld [vmem:[%s581_s2] sm:$0xff] }
  0x27   :  { %v215_v51 = vrot.slane %v177_v37, %v514_v15  ;;  %vm231_vm8 = vcmp.eq.s32.totalorder %v211_v43, %v510_v6  ;;  %v138_v52 = vadd.f32 %v380_v48, %v137_v44  ;;  %v253_v53 = vadd.f32 %v388_v49, %v252_v45 }
  0x28   :  { %v78_v54 = vcombine.high %v62_v35, %v62_v35  ;;  %v104_v55 = vrot.slane %v76_v46, %v514_v15  ;;  %v381_v56 = vsel %vm116_vm7, 1.0, %v469_v1  ;;  %v389_v57 = vsel %vm231_vm8, 1.0, %v469_v1 }
  0x29   :  { %vm117_vm9 = vcmp.eq.s32.totalorder %v100_v47, %v510_v6  ;;  %v193_v58 = vcombine.high %v177_v37, %v177_v37  ;;  %v219_v59 = vrot.slane %v191_v50, %v514_v15  ;;  %vm232_vm10 = vcmp.eq.s32.totalorder %v215_v51, %v510_v6 }
  0x2a   :  { %v139_v60 = vadd.f32 %v381_v56, %v138_v52  ;;  %v254_v61 = vadd.f32 %v389_v57, %v253_v53  ;;  %v80_v62 = vcombine.high %v76_v46, %v76_v46  ;;  %v108_v63 = vrot.slane %v78_v54, %v514_v15 }
  0x2b   :  { %v382_v0 = vsel %vm117_vm9, 1.0, %v469_v1  ;;  %v390_v2 = vsel %vm232_vm10, 1.0, %v469_v1  ;;  %vm118_vm11 = vcmp.eq.s32.totalorder %v104_v55, %v510_v6  ;;  %v195_v3 = vcombine.high %v191_v50, %v191_v50 }
  0x2c   :  { %v223_v4 = vrot.slane %v193_v58, %v514_v15  ;;  %vm233_vm12 = vcmp.eq.s32.totalorder %v219_v59, %v510_v6  ;;  %v140_v5 = vadd.f32 %v382_v0, %v139_v60  ;;  %v255_v7 = vadd.f32 %v390_v2, %v254_v61 }
  0x2d   :  { %v383_v8 = vsel %vm118_vm11, 1.0, %v469_v1  ;;  %v391_v9 = vsel %vm233_vm12, 1.0, %v469_v1  ;;  %v112_v10 = vrot.slane %v80_v62, %v514_v15  ;;  %vm119_vm13 = vcmp.eq.s32.totalorder %v108_v63, %v510_v6 }
  0x2e   :  { %v227_v11 = vrot.slane %v195_v3, %v514_v15  ;;  %vm234_vm14 = vcmp.eq.s32.totalorder %v223_v4, %v510_v6  ;;  %v141_v12 = vadd.f32 %v383_v8, %v140_v5  ;;  %v256_v13 = vadd.f32 %v391_v9, %v255_v7 }
  0x2f   :  { %v384_v14 = vsel %vm119_vm13, 1.0, %v469_v1  ;;  %v392_v16 = vsel %vm234_vm14, 1.0, %v469_v1  ;;  %vm120_vm15 = vcmp.eq.s32.totalorder %v112_v10, %v510_v6  ;;  %vm288_vm2 = vcmask 64512  }
  0x30   :  { %vm235_vm0 = vcmp.eq.s32.totalorder %v227_v11, %v510_v6  ;;  %v142_v17 = vadd.f32 %v384_v14, %v141_v12  ;;  %v257_v18 = vadd.f32 %v392_v16, %v256_v13  ;;  %v385_v19 = vsel %vm120_vm15, 1.0, %v469_v1 }
  0x31   :  { %v393_v20 = vsel %vm235_vm0, 1.0, %v469_v1 }
  0x32   :  { %v143_v21 = vadd.f32 %v385_v19, %v142_v17  ;;  %v258_v15 = vadd.f32 %v393_v20, %v257_v18 }
  0x34   :  { %v259_v22 = vadd.f32 %v258_v15, %v143_v21 }
  0x36   :  { %vm261_vm1 = vcmp.gt.f32.partialorder %v259_v22, 0.0 }
  0x94   :  { %v265_v23 = vpop.permute.xlu0 %264 }
  0x95   :  { %v267_v24 = vsel %vm261_vm1, %v265_v23, -1e+30 }
  0x96   :  { %v268_v25 = vrot.slane %v267_v24, 4 }
  0x98   :  { %v269_v26 = vmax.f32 %v267_v24, %v268_v25 }
  0x9a   :  { %v270_v27 = vrot.slane %v269_v26, 2 }
  0x9c   :  { %v271_v28 = vmax.f32 %v269_v26, %v270_v27 }
  0x9e   :  { %v272_v29 = vrot.slane %v271_v28, 1 }
  0xa0   :  { %v273_v30 = vmax.f32 %v271_v28, %v272_v29 }
  0xa2   :  { %v274_v31 = vsub.f32 %v265_v23, %v273_v30 }
  0xa4   :  { %v275_v6 = vsel %vm261_vm1, %v274_v31, 0.0 }
  0xa5   :  { %v276_v32 = vmul.f32 1.442695, %v275_v6 }
  0xa7   :  { %413 = vpow2.f32 %v276_v32 }
  0xb1   :  { %v414_v33 = vpop.eup %413 }
  0xb2   :  { %v278_v34 = vmul.f32 %v414_v33, %v259_v22 }
  0xb4   :  { %v279_v35 = vrot.slane %v278_v34, 4 }
  0xb6   :  { %v280_v1 = vadd.f32 %v279_v35, %v278_v34 }
  0xb8   :  { %v281_v36 = vrot.slane %v280_v1, 2 }
  0xba   :  { %v282_v37 = vadd.f32 %v281_v36, %v280_v1 }
  0xbc   :  { %v283_v38 = vrot.slane %v282_v37, 1 }
  0xbe   :  { %v284_v39 = vadd.f32 %v283_v38, %v282_v37 }
  0xc0   :  { %415 = vrcp.f32 %v284_v39 }
  0xca   :  { %v416_v40 = vpop.eup %415 }
  0xcb   :  { %v286_v41 = vmul.f32 %v416_v40, %v278_v34 }
  0xcd   :  { %398 = vmatpush3.msra.mxu0 %v286_v41 }
  0xce   :  { %400 = vmatmul.mubr.msk.f32.vlgmr.msra.gmra.mrb[0].mxu0 %vm288_vm2, %v287_v42 }
 0x1a1   :  { %v358_v43 = vpop.f32.mrb[0].mxu0 }
 0x1a2   :  { %362 = vst [vmem:[#allocation5] sm:$0xff] %v358_v43  ;;  %v401_v44 = vpop.f32.mrb[1].mxu0 }
 0x1a3   :  { %450 = shalt.err (!%p447_p12)
}
 0x1a4   :  { %s451_s2 = scalar_lea.hbm %s582_s3, 128 }
 0x1a5   :  { %p452_p13 = scmp.ne.s32.totalorder %s582_s3, %s451_s2  ;;  %p455_p0 = scmp.lt.u32.totalorder %s451_s2, %s582_s3 }
 0x1a7   :  { %p457_p1 = pnand %p455_p0, %p452_p13 }
 0x1a9   :  { %460 = shalt.err (!%p457_p1)
}
 0x1aa   :  { %372 = dma.vmem_to_hbm [thread:$0]  %s370_s29, 128, %s582_s3, [#allocation4]  }
 0x1ab   :  { %463 = dma.done.wait [#allocation4], 128  }
 0x1ac   :  { %464 = vsyncadd [#allocation4], 4294967168 }
 0x1ad   :  { %376 = vsyncpa [#allocation3], 1 }
 0x1ae   :  { %377 = vsyncpa [#allocation4], 1 }

</bundles_post_ra>
